<compile_context>
chip_gen: v7x
topology: tpu7x:2x2x1
jax: 0.10.0
libtpu: 0.0.40
codegen_flags: <defaults>
</compile_context>

<pallas_src>
import dataclasses as dc
import functools

import jax
import jax.numpy as jnp
import numpy as np
from jax.experimental import pallas as pl
from jax.experimental.pallas import tpu as pltpu


@dc.dataclass
class ChatGLMConfig:
    num_layers: int = 2
    kv_channels: int = 16
    multi_query_group_num: int = 2
    pre_seq_len: int = 8
    token_dim: int = 32
    hidden_size: int = 64
    prefix_projection: bool = True


def _round_up(x: int, m: int) -> int:
    return (x + m - 1) // m * m


def _vmem_budget_bytes() -> int:
    """~75% of physical per-core VMEM: headroom for Mosaic scratch/semaphores.
    ~48 MiB on v7x (64 MiB parts), ~96 MiB on v5e/v6e (128 MiB parts)."""
    try:
        cap = int(pltpu.get_tpu_info().vmem_capacity_bytes)
    except Exception:
        cap = 64 * 1024 * 1024
    return cap * 3 // 4


def _spec(block_shape, index_map, *, single_buffer=False):
    """BlockSpec; resident/constant blocks can drop the second pipeline buffer."""
    if single_buffer:
        return pl.BlockSpec(block_shape, index_map, pipeline_mode=pl.Buffered(1))
    return pl.BlockSpec(block_shape, index_map)


def _run_with_fallback(builder, *args):
    """Build with single-buffered resident blocks; if this Pallas build rejects
    pipeline_mode / Buffered(1), fall back to default double buffering."""
    try:
        return builder(True)(*args)
    except Exception:
        return builder(False)(*args)


# ----------------------------------------------------------------------------
# Pallas kernels
# ----------------------------------------------------------------------------
def _h_kernel(x_ref, w1_ref, b1_ref, h_ref):
    """h[i] = tanh(x[i] @ W1 + b1).  Grid = (M tiles, K tiles), K innermost.

    W1 is streamed in (tk, hidden) bf16 tiles; the (tm, hidden) f32 output block
    is resident across the K axis (output index_map ignores k) and used as the
    accumulator.  bf16 x bf16 -> MXU-native with f32 accumulation.
    """
    k = pl.program_id(1)

    @pl.when(k == 0)
    def _():
        h_ref[...] = jnp.zeros_like(h_ref)

    h_ref[...] += jnp.dot(
        x_ref[...].astype(jnp.bfloat16), w1_ref[...],
        preferred_element_type=jnp.float32)

    @pl.when(k == pl.num_programs(1) - 1)
    def _():
        h_ref[...] = jnp.tanh(h_ref[...] + b1_ref[...])


def _out_kernel(h_ref, w2_ref, b2_ref, o_ref):
    """out[i, j] = h[i] @ W2[:, j] + b2[j].  Grid = (M tiles, N tiles), both parallel.

    The streamed, double-buffered (hidden, tn) bf16 W2 tile is the dominant HBM
    traffic; h is quasi-resident (i-only index_map, single buffer).
    """
    o_ref[...] = (
        jnp.dot(h_ref[...].astype(jnp.bfloat16), w2_ref[...],
                preferred_element_type=jnp.float32)
        + b2_ref[...]
    ).astype(o_ref.dtype)


def _embed_kernel(ids_ref, emb_ref, o_ref, *, rows_per_block):
    """Gather `rows_per_block` rows from the VMEM-resident embedding table.

    ids live in SMEM (scalar prefetch); each row is a dynamic sublane read from
    the resident table (no per-row HBM DMA descriptors), written into the
    (rows_per_block, kv_size) output block.
    """
    base = pl.program_id(0) * rows_per_block
    for r in range(rows_per_block):                 # static unroll
        idx = ids_ref[base + r]
        o_ref[pl.ds(r, 1), :] = emb_ref[pl.ds(idx, 1), :]


# ----------------------------------------------------------------------------
# Wrappers
# ----------------------------------------------------------------------------
def prefix_mlp(x2d, w1_bf16, b1, w2_bf16, b2):
    """x2d: (M, token_dim) f32; W1/W2 bf16; b1/b2 f32 -> (M, kv_size) f32."""
    M, token_dim = x2d.shape
    hidden = w1_bf16.shape[1]
    kv_size = w2_bf16.shape[1]
    budget = _vmem_budget_bytes()

    tm = min(_round_up(M, 8), 256)
    m_pad = _round_up(M, tm)
    if m_pad != M:
        x2d = jnp.pad(x2d, ((0, m_pad - M), (0, 0)))

    # -------------------- kernel A: h = tanh(x @ W1 + b1) --------------------
    tk = token_dim
    for cand in (512, 256, 128):
        if token_dim % cand == 0:
            tk = cand
            break
    grid_a = (m_pad // tm, token_dim // tk)
    bytes_a = (2 * tm * tk * 4          # x tiles (f32, double-buffered)
               + 2 * tk * hidden * 2    # W1 tiles (bf16, double-buffered)
               + 2 * hidden * 4         # b1
               + 2 * tm * hidden * 4)   # resident h output block
    vmem_a = int(min(max(2 * bytes_a, 16 << 20), budget))

    def build_h(single_buffer):
        return pl.pallas_call(
            _h_kernel,
            out_shape=jax.ShapeDtypeStruct((m_pad, hidden), jnp.float32),
            grid_spec=pltpu.PrefetchScalarGridSpec(
                num_scalar_prefetch=0,
                grid=grid_a,
                in_specs=[
                    pl.BlockSpec((tm, tk), lambda i, k: (i, k)),
                    pl.BlockSpec((tk, hidden), lambda i, k: (k, 0)),
                    _spec((1, hidden), lambda i, k: (0, 0),
                          single_buffer=single_buffer),
                ],
                out_specs=pl.BlockSpec((tm, hidden), lambda i, k: (i, 0)),
            ),
            compiler_params=pltpu.CompilerParams(
                # K is a reduction into the resident output block -> "arbitrary".
                dimension_semantics=("parallel", "arbitrary"),
                vmem_limit_bytes=vmem_a,
            ),
        )

    h = _run_with_fallback(build_h, x2d, w1_bf16, b1)

    # -------------------- kernel B: out = h @ W2 + b2 --------------------
    n_pad = kv_size if kv_size < 128 else _round_up(kv_size, 128)
    if n_pad != kv_size:                     # keep output stores lane-dense
        w2_bf16 = jnp.pad(w2_bf16, ((0, 0), (0, n_pad - kv_size)))
        b2 = jnp.pad(b2, ((0, 0), (0, n_pad - kv_size)))

    tn = n_pad
    for cand in (1024, 512, 256, 128):
        if n_pad % cand == 0:
            per_step = (tm * hidden * 4          # resident h
                        + 2 * hidden * cand * 2  # W2 bf16 tiles
                        + 2 * cand * 4           # b2 tiles
                        + 2 * tm * cand * 4)     # out tiles
            if per_step <= budget or cand == 128:
                tn = cand
                break
    grid_b = (m_pad // tm, n_pad // tn)
    bytes_b = (tm * hidden * 4 + 2 * hidden * tn * 2 + 2 * tn * 4 + 2 * tm * tn * 4)
    vmem_b = int(min(max(2 * bytes_b, 16 << 20), budget))

    def build_out(single_buffer):
        return pl.pallas_call(
            _out_kernel,
            out_shape=jax.ShapeDtypeStruct((m_pad, n_pad), jnp.float32),
            grid_spec=pltpu.PrefetchScalarGridSpec(
                num_scalar_prefetch=0,
                grid=grid_b,
                in_specs=[
                    _spec((tm, hidden), lambda i, j: (i, 0),
                          single_buffer=single_buffer),
                    pl.BlockSpec((hidden, tn), lambda i, j: (0, j)),
                    pl.BlockSpec((1, tn), lambda i, j: (0, j)),
                ],
                out_specs=pl.BlockSpec((tm, tn), lambda i, j: (i, j)),
            ),
            compiler_params=pltpu.CompilerParams(
                # No cross-step state -> both axes parallel; on v7x the two
                # TensorCores stream disjoint halves of the W2 columns.
                dimension_semantics=("parallel", "parallel"),
                vmem_limit_bytes=vmem_b,
            ),
        )

    out = _run_with_fallback(build_out, h, w2_bf16, b2)
    return out[:M, :kv_size]


def prefix_embedding_lookup(ids_flat, emb_table):
    """ids_flat: (M,) int, emb_table: (V, kv_size) f32 -> (M, kv_size) f32."""
    M = ids_flat.shape[0]
    V, kv_size = emb_table.shape
    itemsize = emb_table.dtype.itemsize
    budget = _vmem_budget_bytes()
    # TODO(synk): if the table ever outgrows the VMEM budget, fall back to a manual
    # double-buffered HBM row gather (make_async_copy); P-tuning tables never do.

    ids_flat = jnp.clip(ids_flat.astype(jnp.int32), 0, V - 1)   # guard OOB rows
    rows_per_block = min(32, _round_up(M, 8))
    m_pad = _round_up(M, rows_per_block)
    if m_pad != M:
        ids_flat = jnp.pad(ids_flat, (0, m_pad - M))            # row 0 is always valid

    grid = (m_pad // rows_per_block,)
    vmem = int(min(max(2 * (V * kv_size * itemsize
                            + 2 * rows_per_block * kv_size * itemsize),
                       16 << 20), budget))

    def build(single_buffer):
        return pl.pallas_call(
            functools.partial(_embed_kernel, rows_per_block=rows_per_block),
            out_shape=jax.ShapeDtypeStruct((m_pad, kv_size), emb_table.dtype),
            grid_spec=pltpu.PrefetchScalarGridSpec(
                num_scalar_prefetch=1,                # ids land in SMEM as scalars
                grid=grid,
                in_specs=[
                    # Whole table resident in VMEM: constant index_map -> one DMA total.
                    _spec((V, kv_size), lambda i, ids: (0, 0),
                          single_buffer=single_buffer),
                ],
                out_specs=pl.BlockSpec((rows_per_block, kv_size),
                                       lambda i, ids: (i, 0)),
            ),
            compiler_params=pltpu.CompilerParams(
                dimension_semantics=("parallel",),    # independent row blocks
                vmem_limit_bytes=vmem,
            ),
        )

    out = _run_with_fallback(build, ids_flat, emb_table)
    return out[:M]


class PrefixEncoderPallas:
    """JAX/Pallas re-implementation of the PyTorch PrefixEncoder module."""

    def __init__(self, config: ChatGLMConfig, key):
        self.config = config
        self.prefix_projection = config.prefix_projection
        kv_size = (config.num_layers * config.kv_channels
                   * config.multi_query_group_num * 2)
        self.kv_size = kv_size
        k_emb, k_w1, k_b1, k_w2, k_b2 = jax.random.split(key, 5)
        # Deterministic synthetic parameters (not a checkpoint load).
        self.embedding = jax.random.normal(
            k_emb, (config.pre_seq_len, kv_size), jnp.float32) * 0.02
        if self.prefix_projection:
            self.w1 = jax.random.normal(
                k_w1, (config.token_dim, config.hidden_size), jnp.float32
            ) * (1.0 / np.sqrt(config.token_dim))
            self.b1 = jax.random.normal(k_b1, (1, config.hidden_size), jnp.float32) * 0.01
            self.w2 = jax.random.normal(
                k_w2, (config.hidden_size, kv_size), jnp.float32
            ) * (1.0 / np.sqrt(config.hidden_size))
            self.b2 = jax.random.normal(k_b2, (1, kv_size), jnp.float32) * 0.01
            # Streamed weight copies in bf16 (the HBM-traffic-dominant operands).
            self.w1_bf16 = self.w1.astype(jnp.bfloat16)
            self.w2_bf16 = self.w2.astype(jnp.bfloat16)

    def __call__(self, prefix):
        if self.prefix_projection:
            # prefix: (..., token_dim) float -> (..., kv_size)
            prefix = prefix.astype(jnp.float32)
            lead = prefix.shape[:-1]
            x2d = prefix.reshape(-1, self.config.token_dim)
            out = prefix_mlp(x2d, self.w1_bf16, self.b1, self.w2_bf16, self.b2)
            return out.reshape(*lead, self.kv_size)
        else:
            # prefix: (batch, prefix_len) int -> (batch, prefix_len, kv_size)
            lead = prefix.shape
            ids_flat = prefix.reshape(-1).astype(jnp.int32)
            out = prefix_embedding_lookup(ids_flat, self.embedding)
            return out.reshape(*lead, self.kv_size)


if __name__ == "__main__":
    cfg = ChatGLMConfig()          # kv_size = 2*16*2*2 = 128
    batch, prefix_len = 2, cfg.pre_seq_len
    key = jax.random.PRNGKey(0)
    k_model, k_in = jax.random.split(key)

    # --- projection branch (Linear -> Tanh -> Linear) ------------------------
    enc_proj = PrefixEncoderPallas(dc.replace(cfg, prefix_projection=True), k_model)
    prefix_feats = jax.random.normal(
        k_in, (batch, prefix_len, cfg.token_dim), jnp.float32)
    out_proj = jax.block_until_ready(enc_proj(prefix_feats))
    assert out_proj.shape == (batch, prefix_len, enc_proj.kv_size)

    # Numpy f32 reference using the same bf16-rounded operands the kernel feeds
    # to the MXU (weights stored bf16; activations rounded to bf16 at the dot).
    def _bf16(a):
        return np.asarray(jnp.asarray(a, jnp.float32).astype(jnp.bfloat16)
                          .astype(jnp.float32))

    x_np = np.asarray(prefix_feats, np.float32).reshape(-1, cfg.token_dim)
    h_np = np.tanh(_bf16(x_np) @ _bf16(enc_proj.w1) + np.asarray(enc_proj.b1))
    ref_proj = (_bf16(h_np) @ _bf16(enc_proj.w2) + np.asarray(enc_proj.b2)
                ).reshape(batch, prefix_len, enc_proj.kv_size)
    # bf16 re-rounding of h + MXU/EUP vs numpy differences -> modest tolerance.
    np.testing.assert_allclose(np.asarray(out_proj), ref_proj, rtol=1e-2, atol=1e-2)

    # --- embedding branch -----------------------------------------------------
    enc_emb = PrefixEncoderPallas(dc.replace(cfg, prefix_projection=False), k_model)
    prefix_ids = jnp.tile(jnp.arange(prefix_len, dtype=jnp.int32)[None, :], (batch, 1))
    out_emb = jax.block_until_ready(enc_emb(prefix_ids))
    assert out_emb.shape == (batch, prefix_len, enc_emb.kv_size)
    ref_emb = np.asarray(enc_emb.embedding)[np.asarray(prefix_ids)]
    np.testing.assert_allclose(np.asarray(out_emb), ref_emb, rtol=0, atol=0)

    print("KERNEL_OK")
</pallas_src>

<mosaic_0001>
module attributes {stable_mosaic.version = 11 : i64} {
  func.func @_h_kernel(%arg0: i32, %arg1: i32, %arg2: memref<16x32xf32, #tpu.memory_space<vmem>>, %arg3: memref<32x64xbf16, #tpu.memory_space<vmem>>, %arg4: memref<1x64xf32, #tpu.memory_space<vmem>>, %arg5: memref<16x64xf32, #tpu.memory_space<vmem>>) attributes {dimension_semantics = [#tpu.dimension_semantics<parallel>, #tpu.dimension_semantics<arbitrary>], iteration_bounds = array<i64: 1, 1>, scalar_prefetch = 0 : i64, scratch_operands = 0 : i64, tpu.core_type = #tpu.core_type<tc>, window_params = [{transform_indices = @transform_0, window_bounds = array<i64: 16, 32>}, {transform_indices = @transform_1, window_bounds = array<i64: 32, 64>}, {pipeline_mode = #tpu.pipeline_mode<synchronous>, transform_indices = @transform_2, window_bounds = array<i64: 1, 64>}, {transform_indices = @transform_3, window_bounds = array<i64: 16, 64>}]} {
    %c0_i32 = arith.constant 0 : i32
    %0 = arith.cmpi eq, %arg1, %c0_i32 : i32
    %1 = arith.extui %0 : i1 to i32
    %c0_i32_0 = arith.constant 0 : i32
    %2 = arith.cmpi ne, %1, %c0_i32_0 : i32
    scf.if %2 {
      %cst_10 = arith.constant 0.000000e+00 : f32
      %13 = vector.broadcast %cst_10 : f32 to vector<16x64xf32>
      %c0_11 = arith.constant 0 : index
      %c0_12 = arith.constant 0 : index
      %14 = vector.load %arg5[%c0_11, %c0_12] : memref<16x64xf32, #tpu.memory_space<vmem>>, vector<16x64xf32>
      tpu.vector_store %arg5[%c0_11, %c0_12], %13 {strides = array<i32>} : memref<16x64xf32, #tpu.memory_space<vmem>>, vector<16x64xf32>,
    } else {
    }
    %c0 = arith.constant 0 : index
    %c0_1 = arith.constant 0 : index
    %3 = vector.load %arg5[%c0, %c0_1] : memref<16x64xf32, #tpu.memory_space<vmem>>, vector<16x64xf32>
    %c0_2 = arith.constant 0 : index
    %c0_3 = arith.constant 0 : index
    %4 = vector.load %arg2[%c0_2, %c0_3] : memref<16x32xf32, #tpu.memory_space<vmem>>, vector<16x32xf32>
    %5 = arith.truncf %4 : vector<16x32xf32> to vector<16x32xbf16>
    %c0_4 = arith.constant 0 : index
    %c0_5 = arith.constant 0 : index
    %6 = vector.load %arg3[%c0_4, %c0_5] : memref<32x64xbf16, #tpu.memory_space<vmem>>, vector<32x64xbf16>
    %cst = arith.constant dense<0.000000e+00> : vector<16x64xf32>
    %7 = tpu.matmul %5, %6, %cst {dimension_numbers = #tpu.dot_dimension_numbers<[1], [0], [0], [1], [0, 0, 1, 1], [], []>} : vector<16x32xbf16>, vector<32x64xbf16>, vector<16x64xf32> -> vector<16x64xf32>
    %8 = arith.addf %3, %7 : vector<16x64xf32>
    %c0_6 = arith.constant 0 : index
    %c0_7 = arith.constant 0 : index
    %9 = vector.load %arg5[%c0_6, %c0_7] : memref<16x64xf32, #tpu.memory_space<vmem>>, vector<16x64xf32>
    tpu.vector_store %arg5[%c0_6, %c0_7], %8 {strides = array<i32>} : memref<16x64xf32, #tpu.memory_space<vmem>>, vector<16x64xf32>,
    %c0_i32_8 = arith.constant 0 : i32
    %10 = arith.cmpi eq, %arg1, %c0_i32_8 : i32
    %11 = arith.extui %10 : i1 to i32
    %c0_i32_9 = arith.constant 0 : i32
    %12 = arith.cmpi ne, %11, %c0_i32_9 : i32
    scf.if %12 {
      %c0_10 = arith.constant 0 : index
      %c0_11 = arith.constant 0 : index
      %13 = vector.load %arg5[%c0_10, %c0_11] : memref<16x64xf32, #tpu.memory_space<vmem>>, vector<16x64xf32>
      %c0_12 = arith.constant 0 : index
      %c0_13 = arith.constant 0 : index
      %14 = vector.load %arg4[%c0_12, %c0_13] : memref<1x64xf32, #tpu.memory_space<vmem>>, vector<1x64xf32>
      %15 = vector.broadcast %14 : vector<1x64xf32> to vector<16x64xf32>
      %16 = arith.addf %13, %15 : vector<16x64xf32>
      %17 = math.tanh %16 : vector<16x64xf32>
      %c0_14 = arith.constant 0 : index
      %c0_15 = arith.constant 0 : index
      %18 = vector.load %arg5[%c0_14, %c0_15] : memref<16x64xf32, #tpu.memory_space<vmem>>, vector<16x64xf32>
      tpu.vector_store %arg5[%c0_14, %c0_15], %17 {strides = array<i32>} : memref<16x64xf32, #tpu.memory_space<vmem>>, vector<16x64xf32>,
    } else {
    }
    return
  }
  func.func @transform_0(%arg0: i32, %arg1: i32) -> (i32, i32) {
    %c0_i32 = arith.constant 0 : i32
    return %arg0, %arg1 : i32, i32
  }
  func.func @transform_1(%arg0: i32, %arg1: i32) -> (i32, i32) {
    %c0_i32 = arith.constant 0 : i32
    %c0_i32_0 = arith.constant 0 : i32
    return %arg1, %c0_i32 : i32, i32
  }
  func.func @transform_2(%arg0: i32, %arg1: i32) -> (i32, i32) {
    %c0_i32 = arith.constant 0 : i32
    %c0_i32_0 = arith.constant 0 : i32
    %c0_i32_1 = arith.constant 0 : i32
    return %c0_i32, %c0_i32_0 : i32, i32
  }
  func.func @transform_3(%arg0: i32, %arg1: i32) -> (i32, i32) {
    %c0_i32 = arith.constant 0 : i32
    %c0_i32_0 = arith.constant 0 : i32
    return %arg0, %c0_i32 : i32, i32
  }
}

module attributes {stable_mosaic.version = 11 : i64} {
  func.func @_h_kernel(%arg0: i32, %arg1: i32, %arg2: memref<16x32xf32, #tpu.memory_space<vmem>>, %arg3: memref<32x64xbf16, #tpu.memory_space<vmem>>, %arg4: memref<1x64xf32, #tpu.memory_space<vmem>>, %arg5: memref<16x64xf32, #tpu.memory_space<vmem>>) attributes {dimension_semantics = [#tpu.dimension_semantics<parallel>, #tpu.dimension_semantics<arbitrary>], iteration_bounds = array<i64: 1, 1>, scalar_prefetch = 0 : i64, scratch_operands = 0 : i64, tpu.core_type = #tpu.core_type<tc>, window_params = [{transform_indices = @transform_0, window_bounds = array<i64: 16, 32>}, {transform_indices = @transform_1, window_bounds = array<i64: 32, 64>}, {pipeline_mode = #tpu.pipeline_mode<synchronous>, transform_indices = @transform_2, window_bounds = array<i64: 1, 64>}, {transform_indices = @transform_3, window_bounds = array<i64: 16, 64>}]} {
    %c0_i32 = arith.constant 0 : i32
    %0 = arith.cmpi eq, %arg1, %c0_i32 : i32
    %1 = arith.extui %0 : i1 to i32
    %c0_i32_0 = arith.constant 0 : i32
    %2 = arith.cmpi ne, %1, %c0_i32_0 : i32
    scf.if %2 {
      %cst_10 = arith.constant 0.000000e+00 : f32
      %13 = vector.broadcast %cst_10 : f32 to vector<16x64xf32>
      %c0_11 = arith.constant 0 : index
      %c0_12 = arith.constant 0 : index
      %14 = vector.load %arg5[%c0_11, %c0_12] : memref<16x64xf32, #tpu.memory_space<vmem>>, vector<16x64xf32>
      tpu.vector_store %arg5[%c0_11, %c0_12], %13 {strides = array<i32>} : memref<16x64xf32, #tpu.memory_space<vmem>>, vector<16x64xf32>,
    } else {
    }
    %c0 = arith.constant 0 : index
    %c0_1 = arith.constant 0 : index
    %3 = vector.load %arg5[%c0, %c0_1] : memref<16x64xf32, #tpu.memory_space<vmem>>, vector<16x64xf32>
    %c0_2 = arith.constant 0 : index
    %c0_3 = arith.constant 0 : index
    %4 = vector.load %arg2[%c0_2, %c0_3] : memref<16x32xf32, #tpu.memory_space<vmem>>, vector<16x32xf32>
    %5 = arith.truncf %4 : vector<16x32xf32> to vector<16x32xbf16>
    %c0_4 = arith.constant 0 : index
    %c0_5 = arith.constant 0 : index
    %6 = vector.load %arg3[%c0_4, %c0_5] : memref<32x64xbf16, #tpu.memory_space<vmem>>, vector<32x64xbf16>
    %cst = arith.constant dense<0.000000e+00> : vector<16x64xf32>
    %7 = tpu.matmul %5, %6, %cst {dimension_numbers = #tpu.dot_dimension_numbers<[1], [0], [0], [1], [0, 0, 1, 1], [], []>} : vector<16x32xbf16>, vector<32x64xbf16>, vector<16x64xf32> -> vector<16x64xf32>
    %8 = arith.addf %3, %7 : vector<16x64xf32>
    %c0_6 = arith.constant 0 : index
    %c0_7 = arith.constant 0 : index
    %9 = vector.load %arg5[%c0_6, %c0_7] : memref<16x64xf32, #tpu.memory_space<vmem>>, vector<16x64xf32>
    tpu.vector_store %arg5[%c0_6, %c0_7], %8 {strides = array<i32>} : memref<16x64xf32, #tpu.memory_space<vmem>>, vector<16x64xf32>,
    %c0_i32_8 = arith.constant 0 : i32
    %10 = arith.cmpi eq, %arg1, %c0_i32_8 : i32
    %11 = arith.extui %10 : i1 to i32
    %c0_i32_9 = arith.constant 0 : i32
    %12 = arith.cmpi ne, %11, %c0_i32_9 : i32
    scf.if %12 {
      %c0_10 = arith.constant 0 : index
      %c0_11 = arith.constant 0 : index
      %13 = vector.load %arg5[%c0_10, %c0_11] : memref<16x64xf32, #tpu.memory_space<vmem>>, vector<16x64xf32>
      %c0_12 = arith.constant 0 : index
      %c0_13 = arith.constant 0 : index
      %14 = vector.load %arg4[%c0_12, %c0_13] : memref<1x64xf32, #tpu.memory_space<vmem>>, vector<1x64xf32>
      %15 = vector.broadcast %14 : vector<1x64xf32> to vector<16x64xf32>
      %16 = arith.addf %13, %15 : vector<16x64xf32>
      %17 = math.tanh %16 : vector<16x64xf32>
      %c0_14 = arith.constant 0 : index
      %c0_15 = arith.constant 0 : index
      %18 = vector.load %arg5[%c0_14, %c0_15] : memref<16x64xf32, #tpu.memory_space<vmem>>, vector<16x64xf32>
      tpu.vector_store %arg5[%c0_14, %c0_15], %17 {strides = array<i32>} : memref<16x64xf32, #tpu.memory_space<vmem>>, vector<16x64xf32>,
    } else {
    }
    return
  }
  func.func @transform_0(%arg0: i32, %arg1: i32) -> (i32, i32) {
    %c0_i32 = arith.constant 0 : i32
    return %arg0, %arg1 : i32, i32
  }
  func.func @transform_1(%arg0: i32, %arg1: i32) -> (i32, i32) {
    %c0_i32 = arith.constant 0 : i32
    %c0_i32_0 = arith.constant 0 : i32
    return %arg1, %c0_i32 : i32, i32
  }
  func.func @transform_2(%arg0: i32, %arg1: i32) -> (i32, i32) {
    %c0_i32 = arith.constant 0 : i32
    %c0_i32_0 = arith.constant 0 : i32
    %c0_i32_1 = arith.constant 0 : i32
    return %c0_i32, %c0_i32_0 : i32, i32
  }
  func.func @transform_3(%arg0: i32, %arg1: i32) -> (i32, i32) {
    %c0_i32 = arith.constant 0 : i32
    %c0_i32_0 = arith.constant 0 : i32
    return %arg0, %c0_i32 : i32, i32
  }
}

</mosaic_0001>

<bundles_post_ra>
// kernel: tpu_custom_call.1
= control target key start
LH: loop header
LB: loop body
LE: loop exit
PB: predicated region body
PF: predicated region fallthrough
CT: control target
= control target key end

     0   :  { %8 = vsyncpa [#allocation3], 0  ;;  %s340_s0 = inlined_call_operand.hbm [shape: f32[16,32], index: 0, kind: input, shape index: {}]   ;;  %s341_s1 = inlined_call_operand.hbm [shape: bf16[32,64], index: 1, kind: input, shape index: {}]   ;;  %s342_s2 = inlined_call_operand.vmem [shape: f32[1,64], index: 2, kind: input, shape index: {}]   ;;  %s343_s3 = inlined_call_operand.hbm [shape: f32[16,64], index: 3, kind: output, shape index: {}]  }
   0x1   :  { %9 = vsyncpa [#allocation6], 0 }
   0x2   :  { %10 = vsyncpa [#allocation4], 0  ;;  %s260_s12 = smov [#allocation2]   ;;  %s188_s16 = scalar_lea.hbm %s340_s0, 256 }
   0x3   :  { %s16_s13 = sshll.u32 %s260_s12, 4  ;;  %p189_p0 = scmp.ne.s32.totalorder %s340_s0, %s188_s16  ;;  %s17_s13 = int_to_ptr.vmem [resolvable:$true] %s16_s13 }
   0x4   :  { %p192_p1 = scmp.lt.u32.totalorder %s188_s16, %s340_s0 }
   0x6   :  { %p194_p2 = pnand %p192_p1, %p189_p0 }
   0x8   :  { %197 = shalt.err (!%p194_p2)
}
   0x9   :  { %s198_s21 = scalar_lea.vmem %s17_s13, 256  ;;  %p203_p4 = scmp.lt.s32.totalorder %s17_s13, %s17_s13 }
   0xa   :  { %p199_p3 = scmp.ne.s32.totalorder %s17_s13, %s198_s21  ;;  %p204_p5 = scmp.lt.s32.totalorder %s198_s21, %s198_s21 }
   0xc   :  { %p205_p6 = por %p204_p5, %p203_p4 }
   0xe   :  { %p206_p7 = pnand %p205_p6, %p199_p3 }
  0x10   :  { %209 = shalt.err (!%p206_p7)
}
  0x11   :  { %s261_s22 = smov 128   ;;  %s262_s23 = smov 8  }
  0x12   :  { %22 = dma.hbm_to_vmem [thread:$0]  %s340_s0, 256, %s17_s13, [#allocation3], %s261_s22, %s261_s22, %s262_s23  }
  0x13   :  { %s263_s26 = smov [#allocation5]   ;;  %s210_s30 = scalar_lea.hbm %s341_s1, 256 }
  0x14   :  { %s28_s27 = sshll.u32 %s263_s26, 4  ;;  %p211_p8 = scmp.ne.s32.totalorder %s341_s1, %s210_s30  ;;  %s29_s27 = int_to_ptr.vmem [resolvable:$true] %s28_s27 }
  0x15   :  { %p214_p9 = scmp.lt.u32.totalorder %s210_s30, %s341_s1 }
  0x17   :  { %p216_p10 = pnand %p214_p9, %p211_p8 }
  0x19   :  { %219 = shalt.err (!%p216_p10)
}
  0x1a   :  { %s220_s8 = scalar_lea.vmem %s29_s27, 256  ;;  %p225_p12 = scmp.lt.s32.totalorder %s29_s27, %s29_s27 }
  0x1b   :  { %p221_p11 = scmp.ne.s32.totalorder %s29_s27, %s220_s8  ;;  %p226_p13 = scmp.lt.s32.totalorder %s220_s8, %s220_s8 }
  0x1d   :  { %p227_p0 = por %p226_p13, %p225_p12 }
  0x1f   :  { %p228_p1 = pnand %p227_p0, %p221_p11 }
  0x21   :  { %231 = shalt.err (!%p228_p1)
}
  0x22   :  { %s264_s0 = smov 64   ;;  %s265_s9 = smov 4  }
  0x23   :  { %34 = dma.hbm_to_vmem [thread:$0]  %s341_s1, 256, %s29_s27, [#allocation6], %s264_s0, %s264_s0, %s265_s9  }
  0x24   :  { %254 = dma.done.wait [#allocation3], 256  }
  0x25   :  { %255 = vsyncadd [#allocation3], 4294967040 }
  0x26   :  { %256 = dma.done.wait [#allocation6], 256  }
  0x27   :  { %257 = vsyncadd [#allocation6], 4294967040  ;;  %vm48_vm0 = vcmask 523264   ;;  %v266_v0 = vmov 0.0   ;;  %vm267_vm1 = vmmov 0   ;;  %v182_v1 = vld [vmem:[#allocation5] sm:$0xff]  }
  0x28   :  { %49 = vst.msk [vmem:[#allocation7] sm:$0xff] %vm48_vm0, %v266_v0  ;;  %50 = vst.msk [vmem:[#allocation7 + $0x8] sm:$0xff] %vm48_vm0, %v266_v0  ;;  %165 = vmatprep.subr.bf16.mxu0 %v266_v0  ;;  %169 = vmatprep.mubr.msk.bf16.mxu0 %vm267_vm1, %v266_v0  ;;  %v183_v2 = vld [vmem:[#allocation5 + $0x8] sm:$0xff]   ;;  %v53_v3 = vld [vmem:[#allocation2] sm:$0xff]  ;;  %vm72_vm2 = vcmask 261120   ;;  %s268_s13 = smov [#allocation7]  }
  0x29   :  { %166 = vmatpush3.bf16.msra.mxu0 %v182_v1  ;;  %v54_v4 = vld [vmem:[#allocation2 + $0x8] sm:$0xff]  ;;  %v161_v14 = vld [vmem:[%s342_s2] ss:$0 sm:$0xff]  ;;  %s145_s14 = sshll.u32 %s268_s13, 4  ;;  %s146_s14 = int_to_ptr.vmem [resolvable:$true] %s145_s14 }
  0x2a   :  { %167 = vmatprep.subr.bf16.mxu0 %v266_v0  ;;  %v55_v5 = vpack.c.bf16 %v54_v4, %v53_v3  ;;  %s232_s15 = scalar_lea.vmem %s146_s14, 256  ;;  %p237_p3 = scmp.lt.s32.totalorder %s146_s14, %s146_s14 }
  0x2b   :  { %p233_p2 = scmp.ne.s32.totalorder %s146_s14, %s232_s15  ;;  %p238_p4 = scmp.lt.s32.totalorder %s232_s15, %s232_s15 }
  0x2d   :  { %168 = vmatpush3.bf16.msra.mxu0 %v183_v2  ;;  %p239_p5 = por %p238_p4, %p237_p3 }
  0x2f   :  { %v51_v6 = vld [vmem:[#allocation7] sm:$0xff]  ;;  %v52_v8 = vld [vmem:[#allocation7 + $0x8] sm:$0xff]  ;;  %p240_p6 = pnand %p239_p5, %p233_p2 }
  0x30   :  { %170 = vmatmul.mubr.msk.bf16.vlgmr.msra.gmra.mrb[0].mxu0 %vm72_vm2, %v55_v5 }
 0x103   :  { %v110_v7 = vpop.f32.mrb[0].mxu0 }
 0x104   :  { %v117_v9 = vadd.f32 %v110_v7, %v51_v6  ;;  %v171_v10 = vpop.f32.mrb[1].mxu0 }
 0x105   :  { %v113_v11 = vpop.f32.mrb[2].mxu0 }
 0x106   :  { %120 = vst.msk [vmem:[#allocation7] sm:$0xff] %vm48_vm0, %v117_v9  ;;  %v118_v12 = vadd.f32 %v113_v11, %v52_v8  ;;  %v172_v13 = vpop.f32.mrb[3].mxu0 }
 0x108   :  { %121 = vst.msk [vmem:[#allocation7 + $0x8] sm:$0xff] %vm48_vm0, %v118_v12 }
 0x10d   :  { %v125_v15 = vld [vmem:[#allocation7] sm:$0xff] }
 0x10e   :  { %v134_v16 = vadd.f32 %v161_v14, %v125_v15 }
 0x10f   :  { %v126_v17 = vld [vmem:[#allocation7 + $0x8] sm:$0xff] }
 0x110   :  { %v135_v18 = vadd.f32 %v161_v14, %v126_v17  ;;  %184 = vtanh.f32 %v134_v16 }
 0x112   :  { %186 = vtanh.f32 %v135_v18 }
 0x11a   :  { %v185_v19 = vpop.eup %184 }
 0x11b   :  { %138 = vst.msk [vmem:[#allocation7] sm:$0xff] %vm48_vm0, %v185_v19 }
 0x11c   :  { %v187_v20 = vpop.eup %186 }
 0x11d   :  { %139 = vst.msk [vmem:[#allocation7 + $0x8] sm:$0xff] %vm48_vm0, %v187_v20 }
 0x11e   :  { %243 = shalt.err (!%p240_p6)
}
 0x11f   :  { %s244_s17 = scalar_lea.hbm %s343_s3, 256 }
 0x120   :  { %p245_p7 = scmp.ne.s32.totalorder %s343_s3, %s244_s17  ;;  %p248_p8 = scmp.lt.u32.totalorder %s244_s17, %s343_s3 }
 0x122   :  { %p250_p9 = pnand %p248_p8, %p245_p7 }
 0x124   :  { %253 = shalt.err (!%p250_p9)
}
 0x125   :  { %151 = dma.vmem_to_hbm [thread:$0]  %s146_s14, 256, %s343_s3, [#allocation4], %s261_s22, %s261_s22, %s262_s23  }
 0x126   :  { %258 = dma.done.wait [#allocation4], 256  }
 0x127   :  { %259 = vsyncadd [#allocation4], 4294967040 }
 0x128   :  { %155 = vsyncpa [#allocation3], 1 }
 0x129   :  { %156 = vsyncpa [#allocation6], 1 }
 0x12a   :  { %157 = vsyncpa [#allocation4], 1 }

// kernel: tpu_custom_call.1
= control target key start
LH: loop header
LB: loop body
LE: loop exit
PB: predicated region body
PF: predicated region fallthrough
CT: control target
= control target key end

     0   :  { %8 = vsyncpa [#allocation3], 0  ;;  %s340_s0 = inlined_call_operand.hbm [shape: f32[16,32], index: 0, kind: input, shape index: {}]   ;;  %s341_s1 = inlined_call_operand.hbm [shape: bf16[32,64], index: 1, kind: input, shape index: {}]   ;;  %s342_s2 = inlined_call_operand.vmem [shape: f32[1,64], index: 2, kind: input, shape index: {}]   ;;  %s343_s3 = inlined_call_operand.hbm [shape: f32[16,64], index: 3, kind: output, shape index: {}]  }
   0x1   :  { %9 = vsyncpa [#allocation6], 0 }
   0x2   :  { %10 = vsyncpa [#allocation4], 0  ;;  %s260_s12 = smov [#allocation2]   ;;  %s188_s16 = scalar_lea.hbm %s340_s0, 256 }
   0x3   :  { %s16_s13 = sshll.u32 %s260_s12, 4  ;;  %p189_p0 = scmp.ne.s32.totalorder %s340_s0, %s188_s16  ;;  %s17_s13 = int_to_ptr.vmem [resolvable:$true] %s16_s13 }
   0x4   :  { %p192_p1 = scmp.lt.u32.totalorder %s188_s16, %s340_s0 }
   0x6   :  { %p194_p2 = pnand %p192_p1, %p189_p0 }
   0x8   :  { %197 = shalt.err (!%p194_p2)
}
   0x9   :  { %s198_s21 = scalar_lea.vmem %s17_s13, 256  ;;  %p203_p4 = scmp.lt.s32.totalorder %s17_s13, %s17_s13 }
   0xa   :  { %p199_p3 = scmp.ne.s32.totalorder %s17_s13, %s198_s21  ;;  %p204_p5 = scmp.lt.s32.totalorder %s198_s21, %s198_s21 }
   0xc   :  { %p205_p6 = por %p204_p5, %p203_p4 }
   0xe   :  { %p206_p7 = pnand %p205_p6, %p199_p3 }
  0x10   :  { %209 = shalt.err (!%p206_p7)
}
  0x11   :  { %s261_s22 = smov 128   ;;  %s262_s23 = smov 8  }
  0x12   :  { %22 = dma.hbm_to_vmem [thread:$0]  %s340_s0, 256, %s17_s13, [#allocation3], %s261_s22, %s261_s22, %s262_s23  }
  0x13   :  { %s263_s26 = smov [#allocation5]   ;;  %s210_s30 = scalar_lea.hbm %s341_s1, 256 }
  0x14   :  { %s28_s27 = sshll.u32 %s263_s26, 4  ;;  %p211_p8 = scmp.ne.s32.totalorder %s341_s1, %s210_s30  ;;  %s29_s27 = int_to_ptr.vmem [resolvable:$true] %s28_s27 }
  0x15   :  { %p214_p9 = scmp.lt.u32.totalorder %s210_s30, %s341_s1 }
  0x17   :  { %p216_p10 = pnand %p214_p9, %p211_p8 }
  0x19   :  { %219 = shalt.err (!%p216_p10)
}
  0x1a   :  { %s220_s8 = scalar_lea.vmem %s29_s27, 256  ;;  %p225_p12 = scmp.lt.s32.totalorder %s29_s27, %s29_s27 }
  0x1b   :  { %p221_p11 = scmp.ne.s32.totalorder %s29_s27, %s220_s8  ;;  %p226_p13 = scmp.lt.s32.totalorder %s220_s8, %s220_s8 }
  0x1d   :  { %p227_p0 = por %p226_p13, %p225_p12 }
  0x1f   :  { %p228_p1 = pnand %p227_p0, %p221_p11 }
  0x21   :  { %231 = shalt.err (!%p228_p1)
}
  0x22   :  { %s264_s0 = smov 64   ;;  %s265_s9 = smov 4  }
  0x23   :  { %34 = dma.hbm_to_vmem [thread:$0]  %s341_s1, 256, %s29_s27, [#allocation6], %s264_s0, %s264_s0, %s265_s9  }
  0x24   :  { %254 = dma.done.wait [#allocation3], 256  }
  0x25   :  { %255 = vsyncadd [#allocation3], 4294967040 }
  0x26   :  { %256 = dma.done.wait [#allocation6], 256  }
  0x27   :  { %257 = vsyncadd [#allocation6], 4294967040  ;;  %vm48_vm0 = vcmask 523264   ;;  %v266_v0 = vmov 0.0   ;;  %vm267_vm1 = vmmov 0   ;;  %v182_v1 = vld [vmem:[#allocation5] sm:$0xff]  }
  0x28   :  { %49 = vst.msk [vmem:[#allocation7] sm:$0xff] %vm48_vm0, %v266_v0  ;;  %50 = vst.msk [vmem:[#allocation7 + $0x8] sm:$0xff] %vm48_vm0, %v266_v0  ;;  %165 = vmatprep.subr.bf16.mxu0 %v266_v0  ;;  %169 = vmatprep.mubr.msk.bf16.mxu0 %vm267_vm1, %v266_v0  ;;  %v183_v2 = vld [vmem:[#allocation5 + $0x8] sm:$0xff]   ;;  %v53_v3 = vld [vmem:[#allocation2] sm:$0xff]  ;;  %vm72_vm2 = vcmask 261120   ;;  %s268_s13 = smov [#allocation7]  }
  0x29   :  { %166 = vmatpush3.bf16.msra.mxu0 %v182_v1  ;;  %v54_v4 = vld [vmem:[#allocation2 + $0x8] sm:$0xff]  ;;  %v161_v14 = vld [vmem:[%s342_s2] ss:$0 sm:$0xff]  ;;  %s145_s14 = sshll.u32 %s268_s13, 4  ;;  %s146_s14 = int_to_ptr.vmem [resolvable:$true] %s145_s14 }
  0x2a   :  { %167 = vmatprep.subr.bf16.mxu0 %v266_v0  ;;  %v55_v5 = vpack.c.bf16 %v54_v4, %v53_v3  ;;  %s232_s15 = scalar_lea.vmem %s146_s14, 256  ;;  %p237_p3 = scmp.lt.s32.totalorder %s146_s14, %s146_s14 }
  0x2b   :  { %p233_p2 = scmp.ne.s32.totalorder %s146_s14, %s232_s15  ;;  %p238_p4 = scmp.lt.s32.totalorder %s232_s15, %s232_s15 }
  0x2d   :  { %168 = vmatpush3.bf16.msra.mxu0 %v183_v2  ;;  %p239_p5 = por %p238_p4, %p237_p3 }
  0x2f   :  { %v51_v6 = vld [vmem:[#allocation7] sm:$0xff]  ;;  %v52_v8 = vld [vmem:[#allocation7 + $0x8] sm:$0xff]  ;;  %p240_p6 = pnand %p239_p5, %p233_p2 }
  0x30   :  { %170 = vmatmul.mubr.msk.bf16.vlgmr.msra.gmra.mrb[0].mxu0 %vm72_vm2, %v55_v5 }
 0x103   :  { %v110_v7 = vpop.f32.mrb[0].mxu0 }
 0x104   :  { %v117_v9 = vadd.f32 %v110_v7, %v51_v6  ;;  %v171_v10 = vpop.f32.mrb[1].mxu0 }
 0x105   :  { %v113_v11 = vpop.f32.mrb[2].mxu0 }
 0x106   :  { %120 = vst.msk [vmem:[#allocation7] sm:$0xff] %vm48_vm0, %v117_v9  ;;  %v118_v12 = vadd.f32 %v113_v11, %v52_v8  ;;  %v172_v13 = vpop.f32.mrb[3].mxu0 }
 0x108   :  { %121 = vst.msk [vmem:[#allocation7 + $0x8] sm:$0xff] %vm48_vm0, %v118_v12 }
 0x10d   :  { %v125_v15 = vld [vmem:[#allocation7] sm:$0xff] }
 0x10e   :  { %v134_v16 = vadd.f32 %v161_v14, %v125_v15 }
 0x10f   :  { %v126_v17 = vld [vmem:[#allocation7 + $0x8] sm:$0xff] }
 0x110   :  { %v135_v18 = vadd.f32 %v161_v14, %v126_v17  ;;  %184 = vtanh.f32 %v134_v16 }
 0x112   :  { %186 = vtanh.f32 %v135_v18 }
 0x11a   :  { %v185_v19 = vpop.eup %184 }
 0x11b   :  { %138 = vst.msk [vmem:[#allocation7] sm:$0xff] %vm48_vm0, %v185_v19 }
 0x11c   :  { %v187_v20 = vpop.eup %186 }
 0x11d   :  { %139 = vst.msk [vmem:[#allocation7 + $0x8] sm:$0xff] %vm48_vm0, %v187_v20 }
 0x11e   :  { %243 = shalt.err (!%p240_p6)
}
 0x11f   :  { %s244_s17 = scalar_lea.hbm %s343_s3, 256 }
 0x120   :  { %p245_p7 = scmp.ne.s32.totalorder %s343_s3, %s244_s17  ;;  %p248_p8 = scmp.lt.u32.totalorder %s244_s17, %s343_s3 }
 0x122   :  { %p250_p9 = pnand %p248_p8, %p245_p7 }
 0x124   :  { %253 = shalt.err (!%p250_p9)
}
 0x125   :  { %151 = dma.vmem_to_hbm [thread:$0]  %s146_s14, 256, %s343_s3, [#allocation4], %s261_s22, %s261_s22, %s262_s23  }
 0x126   :  { %258 = dma.done.wait [#allocation4], 256  }
 0x127   :  { %259 = vsyncadd [#allocation4], 4294967040 }
 0x128   :  { %155 = vsyncpa [#allocation3], 1 }
 0x129   :  { %156 = vsyncpa [#allocation6], 1 }
 0x12a   :  { %157 = vsyncpa [#allocation4], 1 }

</bundles_post_ra>
